<compile_context>
chip_gen: v6e
topology: v6e:2x2x1
jax: 0.10.0
libtpu: 0.0.40
codegen_flags: <defaults>
</compile_context>

<pallas_src>
import jax
import jax.numpy as jnp
from jax.experimental import pallas as pl
from jax.experimental.pallas import tpu as pltpu


# ----------------------------------------------------------------------------- kernel
def _moe_grouped_kernel(tile_expert_ref,   # SMEM [n_tiles] int32  (scalar prefetch)
                        tile_valid_ref,    # SMEM [n_tiles] int32  (scalar prefetch)
                        route_ref,         # VMEM [tm, 1]    f32   per-row routing weight
                        x_ref,             # VMEM [tm, H]    bf16  expert-sorted activations
                        w13_ref,           # VMEM [1, H, 2*ti] bf16 fused gate|up projection
                        w2_ref,            # VMEM [1, ti, H] bf16  down projection
                        out_ref):          # VMEM [tm, H]    f32   (resident across i)
    t = pl.program_id(0)
    i = pl.program_id(1)

    # Output block is resident across the I reduction axis; initialize once.
    @pl.when(i == 0)
    def _init():
        out_ref[...] = jnp.zeros_like(out_ref)

    # Trailing tiles beyond the real (padded) token count carry no work.
    @pl.when(tile_valid_ref[t] > 0)
    def _compute():
        x = x_ref[...]                                   # [tm, H]     bf16
        w13 = w13_ref[0]                                 # [H, 2*ti]   bf16
        w2 = w2_ref[0]                                   # [ti, H]     bf16
        ti = w2.shape[0]

        gu = jnp.dot(x, w13, preferred_element_type=jnp.float32)   # [tm, 2*ti] f32
        g = gu[:, :ti]                                   # static lane slices (ti % 128 == 0)
        u = gu[:, ti:]
        h = jax.nn.silu(g) * u                           # f32 epilogue
        h = h * route_ref[...]                           # [tm, ti] * [tm, 1]
        out_ref[...] += jnp.dot(h.astype(w2.dtype), w2,
                                preferred_element_type=jnp.float32)  # [tm, H]


# ----------------------------------------------------------------------------- helpers
def _vmem_limit_bytes():
    """~7/8 of physical per-core VMEM, capped at 112 MiB (v7x: ~56 MiB, v5e/v6e: 112 MiB)."""
    cap = 128 * 1024 * 1024
    try:
        cap = int(pltpu.get_tpu_info().vmem_capacity_bytes)
    except Exception:
        pass
    return int(min(cap - cap // 8, 112 * 1024 * 1024))


def _pick_inter_tile(inter, preferred):
    """Largest multiple of 128 dividing `inter` and <= preferred; fallback to full inter."""
    t = (min(preferred, inter) // 128) * 128
    while t >= 128:
        if inter % t == 0:
            return t
        t -= 128
    return inter


def _pick_token_tile(preferred):
    """128-aligned when >=128 (MXU fill), otherwise 8-aligned (tiny problems)."""
    if preferred >= 128:
        return (preferred // 128) * 128
    return max(8, (preferred // 8) * 8)


def _fuse_gate_up(w1_t, w3_t, ti):
    """Interleave gate/up projections per I-tile so one (1,H,2*ti) block = [w1_i | w3_i].
    One-time weight prep; hoist out of the hot path in production."""
    E, H, I = w1_t.shape
    n_i = I // ti
    w1r = w1_t.reshape(E, H, n_i, ti)
    w3r = w3_t.reshape(E, H, n_i, ti)
    return jnp.concatenate([w1r, w3r], axis=-1).reshape(E, H, 2 * I)


# ----------------------------------------------------------------------------- pallas wrapper
def mixtral_moe_grouped_pallas(x_sorted, row_weight, tile_expert, tile_valid,
                               w13, w2_t, *, tm, ti):
    """
    x_sorted:    [P, H]  bf16 activations, sorted by expert, group-padded to tm
    row_weight:  [P, 1]  f32  per-row routing weight (0 on padding rows)
    tile_expert: [n_tiles] int32 expert id per token tile (scalar prefetch)
    tile_valid:  [n_tiles] int32 1 if tile holds any real rows (scalar prefetch)
    w13:         [E, H, 2*I] bf16 fused gate|up projection (per-ti interleaved)
    w2_t:        [E, I, H]   bf16 down projection
    returns [P, H] f32
    """
    P, H = x_sorted.shape
    E, I, _ = w2_t.shape
    n_tiles = P // tm
    n_i = I // ti

    grid_spec = pltpu.PrefetchScalarGridSpec(
        num_scalar_prefetch=2,
        grid=(n_tiles, n_i),
        in_specs=[
            pl.BlockSpec((tm, 1), lambda t, i, te, tv: (t, 0)),            # routing weight
            pl.BlockSpec((tm, H), lambda t, i, te, tv: (t, 0)),            # x (resident over i)
            pl.BlockSpec((1, H, 2 * ti), lambda t, i, te, tv: (te[t], 0, i)),  # fused w1|w3
            pl.BlockSpec((1, ti, H), lambda t, i, te, tv: (te[t], i, 0)),      # w2
        ],
        out_specs=pl.BlockSpec((tm, H), lambda t, i, te, tv: (t, 0)),      # accumulated output
    )

    cost = pl.CostEstimate(
        flops=6 * P * H * I,
        transcendentals=P * I,
        bytes_accessed=3 * E * H * I * 2 + P * H * (2 + 4) + P * 4,
    )

    return pl.pallas_call(
        _moe_grouped_kernel,
        out_shape=jax.ShapeDtypeStruct((P, H), jnp.float32),
        grid_spec=grid_spec,
        compiler_params=pltpu.CompilerParams(
            dimension_semantics=("parallel", "arbitrary"),
            vmem_limit_bytes=_vmem_limit_bytes()),
        cost_estimate=cost,
    )(tile_expert, tile_valid, row_weight, x_sorted, w13, w2_t)


# ----------------------------------------------------------------------------- full forward
def mixtral_moe_block_forward(hidden_states, params, top_k, *,
                              token_tile=256, inter_tile=512):
    """Forward matching MixtralSparseMoeBlock.forward semantics."""
    B, S, H = hidden_states.shape
    T = B * S
    x_f32 = hidden_states.reshape(T, H).astype(jnp.float32)

    # ---- routing (plain JAX, mirrors the PyTorch module) ----
    logits = x_f32 @ params["gate_w"].T                              # [T, E]
    probs = jax.nn.softmax(logits.astype(jnp.float32), axis=-1)
    top_w, top_idx = jax.lax.top_k(probs, top_k)
    top_w = top_w / jnp.sum(top_w, axis=-1, keepdims=True)           # renormalize
    E = probs.shape[-1]

    # ---- tile sizes ----
    I = params["w1_t"].shape[-1]
    tm = _pick_token_tile(token_tile)
    ti = _pick_inter_tile(I, inter_tile)

    # ---- group (sort) token->expert assignments by expert, pad each group to tm ----
    TK = T * top_k
    flat_expert = top_idx.reshape(-1).astype(jnp.int32)                  # [TK]
    flat_token = jnp.repeat(jnp.arange(T, dtype=jnp.int32), top_k)       # [TK]
    flat_weight = top_w.reshape(-1).astype(jnp.float32)                  # [TK]

    order = jnp.argsort(flat_expert)                                     # stable
    sorted_expert = flat_expert[order]
    sorted_token = flat_token[order]
    sorted_weight = flat_weight[order]

    counts = jnp.bincount(flat_expert, length=E).astype(jnp.int32)       # [E]
    padded = ((counts + tm - 1) // tm) * tm
    group_start = jnp.cumsum(counts) - counts
    pad_start = jnp.cumsum(padded) - padded
    pad_end = jnp.cumsum(padded)

    n_tiles = TK // tm + E            # static upper bound on sum(ceil(counts/tm))
    P = n_tiles * tm

    rank = jnp.arange(TK, dtype=jnp.int32) - group_start[sorted_expert]
    dest = pad_start[sorted_expert] + rank                               # unique, < P

    gather_idx = jnp.zeros((P,), jnp.int32).at[dest].set(sorted_token)
    row_weight = jnp.zeros((P,), jnp.float32).at[dest].set(sorted_weight)

    tile_row0 = jnp.arange(n_tiles, dtype=jnp.int32) * tm
    tile_expert = jnp.searchsorted(pad_end, tile_row0, side="right").astype(jnp.int32)
    tile_valid = (tile_expert < E).astype(jnp.int32)
    tile_expert = jnp.minimum(tile_expert, E - 1)    # clamp trailing dummy tiles

    # ---- gathered activations + fused gate/up weights ----
    x_sorted = x_f32.astype(jnp.bfloat16)[gather_idx]                    # [P, H]
    w13 = _fuse_gate_up(params["w1_t"], params["w3_t"], ti)              # [E, H, 2I]

    out_rows = mixtral_moe_grouped_pallas(
        x_sorted, row_weight.reshape(P, 1), tile_expert, tile_valid,
        w13, params["w2_t"], tm=tm, ti=ti)                               # [P, H] f32

    # ---- scatter-add back to token order (padding rows carry weight 0) ----
    y = jnp.zeros((T, H), jnp.float32).at[gather_idx].add(out_rows)
    return y.reshape(B, S, H)


# ----------------------------------------------------------------------------- params / reference
def make_params(key, hidden, inter, num_experts):
    """Deterministic synthetic parameters (PyTorch nn.Linear weight convention)."""
    ks = jax.random.split(key, 4)
    scale = 0.05
    gate_w = scale * jax.random.normal(ks[0], (num_experts, hidden), jnp.float32)
    w1 = scale * jax.random.normal(ks[1], (num_experts, inter, hidden), jnp.float32)  # gate proj
    w2 = scale * jax.random.normal(ks[2], (num_experts, hidden, inter), jnp.float32)  # down proj
    w3 = scale * jax.random.normal(ks[3], (num_experts, inter, hidden), jnp.float32)  # up proj
    return {
        "gate_w": gate_w,
        "w1": w1, "w2": w2, "w3": w3,   # f32, nn.Linear layout (for reference check)
        # pre-transposed bf16 copies for the kernel (contraction dim leading on RHS)
        "w1_t": jnp.transpose(w1, (0, 2, 1)).astype(jnp.bfloat16),   # [E, H, I]
        "w3_t": jnp.transpose(w3, (0, 2, 1)).astype(jnp.bfloat16),   # [E, H, I]
        "w2_t": jnp.transpose(w2, (0, 2, 1)).astype(jnp.bfloat16),   # [E, I, H]
    }


def _routing(x, params, top_k):
    logits = x @ params["gate_w"].T
    probs = jax.nn.softmax(logits, axis=-1)
    top_w, top_idx = jax.lax.top_k(probs, top_k)
    top_w = top_w / jnp.sum(top_w, axis=-1, keepdims=True)
    T, E = logits.shape
    return jnp.zeros((T, E), jnp.float32).at[
        jnp.arange(T)[:, None], top_idx].add(top_w)


def reference_forward_f32(hidden_states, params, top_k):
    """Pure-f32 JAX reference mirroring the PyTorch module exactly."""
    B, S, H = hidden_states.shape
    x = hidden_states.reshape(-1, H).astype(jnp.float32)
    route = _routing(x, params, top_k)
    out = jnp.zeros_like(x)
    for e in range(route.shape[1]):
        g = x @ params["w1"][e].T
        u = x @ params["w3"][e].T
        y = (jax.nn.silu(g) * u) @ params["w2"][e].T
        out = out + route[:, e:e + 1] * y
    return out.reshape(B, S, H)


def reference_forward_bf16(hidden_states, params, top_k):
    """Reference using the same bf16-cast operands as the kernel (tight check)."""
    B, S, H = hidden_states.shape
    x = hidden_states.reshape(-1, H).astype(jnp.float32)
    route = _routing(x, params, top_k)
    x_bf = x.astype(jnp.bfloat16)
    out = jnp.zeros((x.shape[0], H), jnp.float32)
    for e in range(route.shape[1]):
        g = jnp.dot(x_bf, params["w1_t"][e], preferred_element_type=jnp.float32)
        u = jnp.dot(x_bf, params["w3_t"][e], preferred_element_type=jnp.float32)
        h = (jax.nn.silu(g) * u) * route[:, e:e + 1]
        out = out + jnp.dot(h.astype(jnp.bfloat16), params["w2_t"][e],
                            preferred_element_type=jnp.float32)
    return out.reshape(B, S, H)


# ----------------------------------------------------------------------------- main
if __name__ == "__main__":
    # Small config consistent with MixtralConfig / the ORT test (scaled down).
    batch_size, sequence_length = 2, 16
    hidden_size, intermediate_size = 64, 256
    num_experts, top_k = 8, 2

    key = jax.random.PRNGKey(0)
    k_params, k_x = jax.random.split(key)
    params = make_params(k_params, hidden_size, intermediate_size, num_experts)

    hidden_states = jax.random.normal(
        k_x, (batch_size, sequence_length, hidden_size), jnp.float32)

    # Tiny shapes -> small tiles; at Mixtral scale use token_tile>=256, inter_tile 256-1024.
    out = mixtral_moe_block_forward(hidden_states, params, top_k,
                                    token_tile=16, inter_tile=128)
    out = jax.block_until_ready(out)

    ref_bf16 = jax.block_until_ready(reference_forward_bf16(hidden_states, params, top_k))
    ref_f32 = jax.block_until_ready(reference_forward_f32(hidden_states, params, top_k))

    assert out.shape == (batch_size, sequence_length, hidden_size)
    diff_bf16 = float(jnp.max(jnp.abs(out - ref_bf16)))
    diff_f32 = float(jnp.max(jnp.abs(out - ref_f32)))
    assert diff_bf16 < 1e-3, f"max diff vs bf16-matched reference: {diff_bf16}"
    assert diff_f32 < 3e-2, f"max diff vs f32 reference: {diff_f32}"

    print("KERNEL_OK")
</pallas_src>

<mosaic_0001>
module attributes {stable_mosaic.version = 11 : i64} {
  func.func @_moe_grouped_kernel(%arg0: i32, %arg1: i32, %arg2: memref<12xi32, #tpu.memory_space<smem>>, %arg3: memref<12xi32, #tpu.memory_space<smem>>, %arg4: memref<16x1xf32, #tpu.memory_space<vmem>>, %arg5: memref<16x64xbf16, #tpu.memory_space<vmem>>, %arg6: memref<1x64x256xbf16, #tpu.memory_space<vmem>>, %arg7: memref<1x128x64xbf16, #tpu.memory_space<vmem>>, %arg8: memref<16x64xf32, #tpu.memory_space<vmem>>) attributes {dimension_semantics = [#tpu.dimension_semantics<parallel>, #tpu.dimension_semantics<arbitrary>], iteration_bounds = array<i64: 12, 2>, scalar_prefetch = 2 : i64, scratch_operands = 0 : i64, tpu.core_type = #tpu.core_type<tc>, window_params = [{transform_indices = @transform_0, window_bounds = array<i64: 16, 1>}, {transform_indices = @transform_1, window_bounds = array<i64: 16, 64>}, {transform_indices = @transform_2, window_bounds = array<i64: 1, 64, 256>}, {transform_indices = @transform_3, window_bounds = array<i64: 1, 128, 64>}, {transform_indices = @transform_4, window_bounds = array<i64: 16, 64>}]} {
    %c0_i32 = arith.constant 0 : i32
    %0 = arith.cmpi eq, %arg1, %c0_i32 : i32
    %1 = arith.extui %0 : i1 to i32
    %c0_i32_0 = arith.constant 0 : i32
    %2 = arith.cmpi ne, %1, %c0_i32_0 : i32
    scf.if %2 {
      %cst = arith.constant 0.000000e+00 : f32
      %8 = vector.broadcast %cst : f32 to vector<16x64xf32>
      %c0 = arith.constant 0 : index
      %c0_3 = arith.constant 0 : index
      %9 = vector.load %arg8[%c0, %c0_3] : memref<16x64xf32, #tpu.memory_space<vmem>>, vector<16x64xf32>
      tpu.vector_store %arg8[%c0, %c0_3], %8 {strides = array<i32>} : memref<16x64xf32, #tpu.memory_space<vmem>>, vector<16x64xf32>,
    } else {
    }
    %3 = arith.index_cast %arg0 : i32 to index
    %4 = memref.load %arg3[%3] : memref<12xi32, #tpu.memory_space<smem>>
    %c0_i32_1 = arith.constant 0 : i32
    %5 = arith.cmpi sgt, %4, %c0_i32_1 : i32
    %6 = arith.extui %5 : i1 to i32
    %c0_i32_2 = arith.constant 0 : i32
    %7 = arith.cmpi ne, %6, %c0_i32_2 : i32
    scf.if %7 {
      %c0 = arith.constant 0 : index
      %c0_3 = arith.constant 0 : index
      %8 = vector.load %arg5[%c0, %c0_3] : memref<16x64xbf16, #tpu.memory_space<vmem>>, vector<16x64xbf16>
      %c0_4 = arith.constant 0 : index
      %c0_5 = arith.constant 0 : index
      %c0_6 = arith.constant 0 : index
      %9 = vector.load %arg6[%c0_4, %c0_5, %c0_6] : memref<1x64x256xbf16, #tpu.memory_space<vmem>>, vector<1x64x256xbf16>
      %10 = vector.shape_cast %9 : vector<1x64x256xbf16> to vector<64x256xbf16>
      %c0_7 = arith.constant 0 : index
      %c0_8 = arith.constant 0 : index
      %c0_9 = arith.constant 0 : index
      %11 = vector.load %arg7[%c0_7, %c0_8, %c0_9] : memref<1x128x64xbf16, #tpu.memory_space<vmem>>, vector<1x128x64xbf16>
      %12 = vector.shape_cast %11 : vector<1x128x64xbf16> to vector<128x64xbf16>
      %cst = arith.constant dense<0.000000e+00> : vector<16x256xf32>
      %13 = tpu.matmul %8, %10, %cst {dimension_numbers = #tpu.dot_dimension_numbers<[1], [0], [0], [1], [0, 0, 1, 1], [], []>} : vector<16x64xbf16>, vector<64x256xbf16>, vector<16x256xf32> -> vector<16x256xf32>
      %14 = vector.extract_strided_slice %13 {offsets = [0, 0], sizes = [16, 128], strides = [1, 1]} : vector<16x256xf32> to vector<16x128xf32>
      %15 = vector.extract_strided_slice %13 {offsets = [0, 128], sizes = [16, 128], strides = [1, 1]} : vector<16x256xf32> to vector<16x128xf32>
      %16 = arith.negf %14 : vector<16x128xf32>
      %17 = math.exp %16 : vector<16x128xf32>
      %cst_10 = arith.constant 1.000000e+00 : f32
      %18 = vector.broadcast %cst_10 : f32 to vector<16x128xf32>
      %19 = arith.addf %18, %17 : vector<16x128xf32>
      %20 = arith.divf %18, %19 : vector<16x128xf32>
      %21 = arith.mulf %14, %20 : vector<16x128xf32>
      %22 = arith.mulf %21, %15 : vector<16x128xf32>
      %c0_11 = arith.constant 0 : index
      %c0_12 = arith.constant 0 : index
      %23 = vector.load %arg4[%c0_11, %c0_12] : memref<16x1xf32, #tpu.memory_space<vmem>>, vector<16x1xf32>
      %24 = vector.broadcast %23 : vector<16x1xf32> to vector<16x128xf32>
      %25 = arith.mulf %22, %24 : vector<16x128xf32>
      %c0_13 = arith.constant 0 : index
      %c0_14 = arith.constant 0 : index
      %26 = vector.load %arg8[%c0_13, %c0_14] : memref<16x64xf32, #tpu.memory_space<vmem>>, vector<16x64xf32>
      %27 = arith.truncf %25 : vector<16x128xf32> to vector<16x128xbf16>
      %cst_15 = arith.constant dense<0.000000e+00> : vector<16x64xf32>
      %28 = tpu.matmul %27, %12, %cst_15 {dimension_numbers = #tpu.dot_dimension_numbers<[1], [0], [0], [1], [0, 0, 1, 1], [], []>} : vector<16x128xbf16>, vector<128x64xbf16>, vector<16x64xf32> -> vector<16x64xf32>
      %29 = arith.addf %26, %28 : vector<16x64xf32>
      %c0_16 = arith.constant 0 : index
      %c0_17 = arith.constant 0 : index
      %30 = vector.load %arg8[%c0_16, %c0_17] : memref<16x64xf32, #tpu.memory_space<vmem>>, vector<16x64xf32>
      tpu.vector_store %arg8[%c0_16, %c0_17], %29 {strides = array<i32>} : memref<16x64xf32, #tpu.memory_space<vmem>>, vector<16x64xf32>,
    } else {
    }
    return
  }
  func.func @transform_0(%arg0: i32, %arg1: i32, %arg2: memref<12xi32, #tpu.memory_space<smem>>, %arg3: memref<12xi32, #tpu.memory_space<smem>>) -> (i32, i32) {
    %c0_i32 = arith.constant 0 : i32
    %c0_i32_0 = arith.constant 0 : i32
    return %arg0, %c0_i32 : i32, i32
  }
  func.func @transform_1(%arg0: i32, %arg1: i32, %arg2: memref<12xi32, #tpu.memory_space<smem>>, %arg3: memref<12xi32, #tpu.memory_space<smem>>) -> (i32, i32) {
    %c0_i32 = arith.constant 0 : i32
    %c0_i32_0 = arith.constant 0 : i32
    return %arg0, %c0_i32 : i32, i32
  }
  func.func @transform_2(%arg0: i32, %arg1: i32, %arg2: memref<12xi32, #tpu.memory_space<smem>>, %arg3: memref<12xi32, #tpu.memory_space<smem>>) -> (i32, i32, i32) {
    %0 = arith.index_cast %arg0 : i32 to index
    %1 = memref.load %arg2[%0] : memref<12xi32, #tpu.memory_space<smem>>
    %c0_i32 = arith.constant 0 : i32
    %c0_i32_0 = arith.constant 0 : i32
    return %1, %c0_i32, %arg1 : i32, i32, i32
  }
  func.func @transform_3(%arg0: i32, %arg1: i32, %arg2: memref<12xi32, #tpu.memory_space<smem>>, %arg3: memref<12xi32, #tpu.memory_space<smem>>) -> (i32, i32, i32) {
    %0 = arith.index_cast %arg0 : i32 to index
    %1 = memref.load %arg2[%0] : memref<12xi32, #tpu.memory_space<smem>>
    %c0_i32 = arith.constant 0 : i32
    %c0_i32_0 = arith.constant 0 : i32
    return %1, %arg1, %c0_i32 : i32, i32, i32
  }
  func.func @transform_4(%arg0: i32, %arg1: i32, %arg2: memref<12xi32, #tpu.memory_space<smem>>, %arg3: memref<12xi32, #tpu.memory_space<smem>>) -> (i32, i32) {
    %c0_i32 = arith.constant 0 : i32
    %c0_i32_0 = arith.constant 0 : i32
    return %arg0, %c0_i32 : i32, i32
  }
}

</mosaic_0001>

<bundles_post_ra>
// kernel: tpu_custom_call.1
= control target key start
LH: loop header
LB: loop body
LE: loop exit
PB: predicated region body
PF: predicated region fallthrough
CT: control target
= control target key end

     0   :  { %s1181_s0 = inlined_call_operand.vmem [shape: s32[12], index: 0, kind: input, shape index: {}]   ;;  %s1182_s2 = inlined_call_operand.vmem [shape: f32[192,1], index: 2, kind: input, shape index: {}]   ;;  %s1183_s3 = inlined_call_operand.vmem [shape: bf16[192,64], index: 3, kind: input, shape index: {}]   ;;  %s1184_s4 = inlined_call_operand.vmem [shape: bf16[8,64,512], index: 4, kind: input, shape index: {}]   ;;  %s1185_s5 = inlined_call_operand.vmem [shape: bf16[8,256,64], index: 5, kind: input, shape index: {}]   ;;  %s1186_s6 = inlined_call_operand.vmem [shape: f32[192,64], index: 6, kind: output, shape index: {}]   ;;  %s1187_s1 = inlined_call_operand.vmem [shape: s32[12], index: 1, kind: input, shape index: {}]  }
   0x1   :  { %1188 = sst [smem:[#allocation7_spill]] %s1182_s2  ;;  %s11_s23 = sshll.u32 %s1181_s0, 4  ;;  %s12_s23 = int_to_ptr.vmem [resolvable:$true] %s11_s23 }
   0x2   :  { %s15_s26 = sshll.u32 %s1187_s1, 4  ;;  %s923_s27 = scalar_lea.vmem %s12_s23, 16  ;;  %s16_s26 = int_to_ptr.vmem [resolvable:$true] %s15_s26 }
   0x3   :  { %p924_p0 = scmp.ne.s32.totalorder %s12_s23, %s923_s27  ;;  %p928_p1 = scmp.lt.s32.totalorder %s12_s23, %s12_s23 }
   0x4   :  { %p929_p2 = scmp.lt.s32.totalorder %s923_s27, %s923_s27 }
   0x6   :  { %p930_p3 = por %p929_p2, %p928_p1 }
   0x8   :  { %p931_p4 = pnand %p930_p3, %p924_p0 }
   0xa   :  { %934 = shalt.err (!%p931_p4)  }
   0xb   :  { %s1005_s28 = smov [#allocation3]   ;;  %s935_s29 = scalar_lea.vmem %s16_s26, 16 }
   0xc   :  { %14 = dma.vmem_to_smem %s12_s23, 16, %s1005_s28, [#allocation2] }
   0xd   :  { %p936_p5 = scmp.ne.s32.totalorder %s16_s26, %s935_s29  ;;  %p940_p6 = scmp.lt.s32.totalorder %s16_s26, %s16_s26 }
   0xe   :  { %p941_p7 = scmp.lt.s32.totalorder %s935_s29, %s935_s29 }
  0x10   :  { %p942_p8 = por %p941_p7, %p940_p6 }
  0x12   :  { %p943_p9 = pnand %p942_p8, %p936_p5 }
  0x14   :  { %946 = shalt.err (!%p943_p9)  }
  0x15   :  { %s1006_s0 = smov [#allocation4]  }
  0x16   :  { %18 = dma.vmem_to_smem %s16_s26, 16, %s1006_s0, [#allocation2] }
  0x17   :  { %975 = dma.done.wait [#allocation2], 32 }
  0x18   :  { %976 = vsyncadd [#allocation2], 4294967264 }
  0x19   :  { %20 = sfence }
  0x1a   :  { %s1052_s1 = smov 0   ;;  %s1054_s30 = smov 0  }
  0x1b   :  { %s1056_s7 = smov 0   ;;  %s1058_s8 = smov 0  }
  0x1c   :  { %s1060_s9 = smov 0   ;;  %s1062_s10 = smov 0  }
  0x1d   :  { %s1064_s11 = smov 0  }
  0x1e LB: > { %s35_s12 = sadd.s32 1, %s995_s9  ;;  %s38_s13 = sadd.s32 1, %s999_s10  ;;  %s1003_s11 = sphi %s1064_s11, %s26_s11   ;;  %s999_s10 = sphi %s1062_s10, %s1195_s10   ;;  %s995_s9 = sphi %s1060_s9, %s1194_s9   ;;  %s991_s8 = sphi %s1058_s8, %s1193_s8   ;;  %s987_s7 = sphi %s1056_s7, %s1192_s7   ;;  %s983_s30 = sphi %s1054_s30, %s1191_s30   ;;  %s979_s1 = sphi %s1052_s1, %s1190_s1  }
  0x1f   : > { %p36_p10 = scmp.ge.s32.totalorder %s35_s12, 2  ;;  %p108_p11 = scmp.ne.s32.totalorder %s983_s30, %s979_s1 }
  0x20   : > { %p109_p12 = scmp.eq.s32.totalorder %s1003_s11, 0  ;;  %s94_s14 = sld [smem:[#allocation3 + %s999_s10]] }
  0x21   : > { %s1197_s13 = smov (!%p36_p10, %s38_s13), %s999_s10  ;;  %s1201_s12 = smov (%p36_p10, %s35_s12), 0 }
  0x22   : > { %p40_p13 = scmp.ge.s32.totalorder %s1197_s13, 12  ;;  %p110_p0 = por %p109_p12, %p108_p11 }
  0x23   : > { %s97_s16 = ssub.s32 %s995_s9, %s1201_s12  ;;  %s101_s19 = sadd.s32 1, %s983_s30 }
  0x24   : > { %s1199_s13 = smov (%p40_p13, %s1197_s13), 0  ;;  %p762_p2 = scmp.ge.s32.totalorder %s1003_s11, 24 }
  0x25   : > { %s95_s15 = sld [smem:[#allocation3 + %s1199_s13]] }
  0x2b   : > { %s96_s17 = ssub.s32 %s94_s14, %s95_s15  ;;  %190 = sbr.rel (%p762_p2) target bundleno = 63 (0x3f), region = 16 }
  0x2c   : > { %s98_s18 = sor.u32 %s97_s16, %s96_s17 }
  0x2d   : > { %p99_p1 = scmp.eq.s32.totalorder %s98_s18, 0 }
  0x2f   : > { %s1103_s20 = scalar_select %p99_p1, %s983_s30, %s101_s19  }
  0x30   : > { %211 = sbr.rel (!%p110_p0) target bundleno = 63 (0x3f), region = 28  ;;  %s216_s21 = sld [smem:[#allocation3 + %s999_s10]] (%p110_p0) }
  0x31   : > { %s213_s22 = sand.u32 (%p110_p0), 1, %s983_s30   ;;  %s764_s23 = sshll.u32 (%p110_p0), %s995_s9, 1 }
  0x32   : > { %s763_s24 = sshll.u32 (%p110_p0), %s213_s22, 6 }
  0x33   : > { %s215_s14 = scalar_lea.vmem (%p110_p0), [#allocation5], %s763_s24 }
  0x36   : > { %s765_s25 = sshll.u32 %s216_s21, 5 }
  0x37   : > { %s219_s26 = sadd.s32 %s765_s25, %s764_s23 }
  0x38   : > { %s766_s27 = sshll.u32 %s219_s26, 2 }
  0x39   : > { %s221_s0 = scalar_lea.vmem %s1184_s4, %s766_s27 }
  0x3a   : > { %v264_v0 = vld [vmem:[%s221_s0] sm:$0xff]  ;;  %v266_v1 = vld [vmem:[%s221_s0 + $0x10] sm:$0xff] }
  0x3b   : > { %v268_v2 = vld [vmem:[%s221_s0 + $0x20] sm:$0xff]  ;;  %265 = vst [vmem:[%s215_s14] sm:$0xff] %v264_v0  ;;  %267 = vst [vmem:[%s215_s14 + $0x8] sm:$0xff] %v266_v1  ;;  %v270_v3 = vld [vmem:[%s221_s0 + $0x30] sm:$0xff] }
  0x3c   : > { %269 = vst [vmem:[%s215_s14 + $0x10] sm:$0xff] %v268_v2  ;;  %v272_v4 = vld [vmem:[%s221_s0 + $0x40] sm:$0xff]  ;;  %v274_v5 = vld [vmem:[%s221_s0 + $0x50] sm:$0xff]  ;;  %271 = vst [vmem:[%s215_s14 + $0x18] sm:$0xff] %v270_v3 }
  0x3d   : > { %273 = vst [vmem:[%s215_s14 + $0x20] sm:$0xff] %v272_v4  ;;  %275 = vst [vmem:[%s215_s14 + $0x28] sm:$0xff] %v274_v5  ;;  %v276_v6 = vld [vmem:[%s221_s0 + $0x60] sm:$0xff]  ;;  %v278_v7 = vld [vmem:[%s221_s0 + $0x70] sm:$0xff] }
  0x3e   : > { %277 = vst [vmem:[%s215_s14 + $0x30] sm:$0xff] %v276_v6  ;;  %279 = vst [vmem:[%s215_s14 + $0x38] sm:$0xff] %v278_v7 }
  0x3f PF: > { %p767_p3 = scmp.ge.s32.totalorder %s1003_s11, 1  ;;  %p299_p4 = scmp.lt.s32.totalorder %s1003_s11, 25 }
  0x41   : > { %p300_p5 = pnand %p767_p3, %p299_p4 }
  0x42   : > { %s306_s15 = sand.u32 (!%p300_p5), 1, %s979_s1   ;;  %s769_s16 = sshll.u32 (!%p300_p5), %s991_s8, 1 }
  0x43   : > { %303 = sbr.rel (%p300_p5) target bundleno = 552 (0x228), region = 70  ;;  %s768_s17 = sshll.u32 (!%p300_p5), %s306_s15, 6 }
  0x44   : > { %p352_p6 = scmp.lt.s32.totalorder (!%p300_p5), %s769_s16, 23  ;;  %s365_s18 = sld [smem:[#allocation3 + %s991_s8]] (!%p300_p5) }
  0x45   : > { %s773_s19 = sshll.u32 (!%p300_p5), %s987_s7, 4  ;;  %s1189_s2 = sld [smem:[#allocation7_spill]] (!%p300_p5) }
  0x46   : > { %p369_p7 = scmp.lt.s32.totalorder (!%p300_p5), %s773_s19, 31  ;;  %s308_s26 = scalar_lea.vmem (!%p300_p5), [#allocation5], %s768_s17 }
  0x47   : > { %p778_p9 = scmp.ne.s32.totalorder (!%p300_p5), %s987_s7, 0 }
  0x48   : > { %s1203_s16 = smov (!%p352_p6, %s769_s16), 23  ;;  %s1205_s19 = smov (!%p369_p7, %s773_s19), 31 }
  0x49   : > { %s770_s21 = sshll.u32 %s1203_s16, 3  ;;  %s772_s22 = sshll.u32 %s1203_s16, 2 }
  0x4a   : > { %s1126_s28 = scalar_lea.vmem %s1183_s3, %s772_s22  ;;  %s1131_s0 = scalar_lea.vmem %s1186_s6, %s770_s21 }
  0x4b   : > { %s1121_s25 = scalar_lea.vmem %s1189_s2, %s770_s21  ;;  %p367_p8 = scmp.lt.s32.totalorder %s365_s18, 7 }
  0x4d   : > { %s1207_s18 = smov (!%p367_p8, %s365_s18), 7  ;;  %387 = sbr.rel (%p778_p9) target bundleno = 84 (0x54), region = 78 }
  0x4e   : > { %s774_s14 = sshll.u32 %s1207_s18, 5 }
  0x4f   : > { %s372_s15 = sadd.s32 %s774_s14, %s1205_s19 }
  0x50   : > { %s775_s16 = sshll.u32 %s372_s15, 2 }
  0x51   : > { %s1136_s2 = scalar_lea.vmem %s1185_s5, %s775_s16 }
  0x52   : > { %vm388_vm0 = vcmask 523264   ;;  %v1007_v8 = vmov 0.0  }
  0x53   : > { %389 = vst.msk [vmem:[%s1131_s0] sm:$0xff] %vm388_vm0, %v1007_v8  ;;  %390 = vst.msk [vmem:[%s1131_s0 + $0x8] sm:$0xff] %vm388_vm0, %v1007_v8 }
  0x54 PF: > { %s391_s18 = sld [smem:[#allocation4 + %s991_s8]] }
  0x5a   : > { %p779_p10 = scmp.le.s32.totalorder %s391_s18, 0 }
  0x5c   : > { %395 = sbr.rel (%p779_p10) target bundleno = 552 (0x228), region = 82 }
  0x61   : > { %v894_v9 = vld [vmem:[%s308_s26 + $0x34] ss:$8 sps:$4 sm:$0xff]   ;;  %v896_v10 = vld [vmem:[%s308_s26 + $0x30] ss:$8 sps:$4 sm:$0xff]   ;;  %v1008_v11 = vmov 0   ;;  %v530_v17 = vld [vmem:[%s1121_s25] sm:$0xff] }
  0x62   : > { %503 = vmatprep.mubr.bf16.mxu0 %v1008_v11  ;;  %893 = vset.pattern.permute.xlu0 %v1008_v11  ;;  %v897_v12 = vld [vmem:[%s308_s26 + $0x24] ss:$8 sps:$4 sm:$0xff]   ;;  %v899_v13 = vld [vmem:[%s308_s26 + $0x20] ss:$8 sps:$4 sm:$0xff]   ;;  %v900_v14 = vld [vmem:[%s308_s26 + $0x14] ss:$8 sps:$4 sm:$0xff]  }
  0x63   : > { %479 = vmatprep.subr.bf16.mxu0 %v894_v9  ;;  %v902_v15 = vld [vmem:[%s308_s26 + $0x10] ss:$8 sps:$4 sm:$0xff]   ;;  %v903_v16 = vld [vmem:[%s308_s26 + $0x4] ss:$8 sps:$4 sm:$0xff]   ;;  %534 = vperm.xlu0 %893, %v530_v17   ;;  %v905_v19 = vld [vmem:[%s308_s26] ss:$8 sps:$4 sm:$0xff]  }
  0x64   : > { %480 = vmatpush1.bf16.msra.mxu0 %v896_v10  ;;  %v531_v18 = vld [vmem:[%s1121_s25 + $0x8] sm:$0xff]  ;;  %v906_v20 = vld [vmem:[%s1126_s28] sm:$0xff]   ;;  %vm467_vm1 = vcmask 523264   ;;  %v907_v21 = vld [vmem:[%s1136_s2 + $0x38] sm:$0xff]   ;;  %v1009_v22 = vmov 0.0   ;;  %vm1010_vm2 = vmmov 0  }
  0x65   : > { %481 = vmatprep.subr.bf16.mxu0 %v897_v12  ;;  %811 = vmatprep.subr.bf16.mxu1 %v1009_v22  ;;  %v908_v23 = vld [vmem:[%s1136_s2 + $0x30] sm:$0xff]   ;;  %v909_v24 = vld [vmem:[%s1136_s2 + $0x28] sm:$0xff]   ;;  %v910_v25 = vld [vmem:[%s1136_s2 + $0x20] sm:$0xff]  }
  0x66   : > { %812 = vmatpush3.bf16.msra.mxu1 %v907_v21  ;;  %v911_v26 = vld [vmem:[%s1136_s2 + $0x18] sm:$0xff]   ;;  %v912_v27 = vld [vmem:[%s1136_s2 + $0x10] sm:$0xff]   ;;  %v913_v28 = vld [vmem:[%s1136_s2 + $0x8] sm:$0xff]   ;;  %827 = vmatprep.mubr.msk.bf16.mxu1 %vm1010_vm2, %v1009_v22 }
  0x67   : > { %539 = vperm.xlu0 %893, %v531_v18   ;;  %813 = vmatprep.subr.bf16.mxu1 %v1009_v22  ;;  %v914_v29 = vld [vmem:[%s1136_s2] sm:$0xff]   ;;  %v545_v55 = vld [vmem:[%s1131_s0 + $0x8] sm:$0xff] }
  0x68   : > { %482 = vmatpush1.bf16.msra.mxu0 %v899_v13  ;;  %v544_v51 = vld [vmem:[%s1131_s0] sm:$0xff] }
  0x69   : > { %483 = vmatprep.subr.bf16.mxu0 %v900_v14 }
  0x6a   : > { %814 = vmatpush3.bf16.msra.mxu1 %v908_v23 }
  0x6b   : > { %815 = vmatprep.subr.bf16.mxu1 %v1009_v22 }
  0x6c   : > { %484 = vmatpush1.bf16.msra.mxu0 %v902_v15 }
  0x6d   : > { %485 = vmatprep.subr.bf16.mxu0 %v903_v16 }
  0x6e   : > { %816 = vmatpush3.bf16.msra.mxu1 %v909_v24 }
  0x6f   : > { %817 = vmatprep.subr.bf16.mxu1 %v1009_v22 }
  0x70   : > { %486 = vmatpush1.bf16.msra.mxu0 %v905_v19 }
  0x72   : > { %818 = vmatpush3.bf16.msra.mxu1 %v910_v25 }
  0x73   : > { %789 = vmatmul.mubr.msk.bf16.vlgmr.msra.gmra.mxu0 %vm467_vm1, %v906_v20  ;;  %819 = vmatprep.subr.bf16.mxu1 %v1009_v22 }
  0x76   : > { %820 = vmatpush3.bf16.msra.mxu1 %v911_v26 }
  0x77   : > { %821 = vmatprep.subr.bf16.mxu1 %v1009_v22 }
  0x7a   : > { %822 = vmatpush3.bf16.msra.mxu1 %v912_v27 }
  0x7b   : > { %823 = vmatprep.subr.bf16.mxu1 %v1009_v22 }
  0x7e   : > { %824 = vmatpush3.bf16.msra.mxu1 %v913_v28 }
  0x7f   : > { %825 = vmatprep.subr.bf16.mxu1 %v1009_v22 }
  0x82   : > { %826 = vmatpush3.bf16.msra.mxu1 %v914_v29 }
  0xde   : > { %v535_v41 = vpop.permute.xlu0 %534 }
  0xe2   : > { %v540_v47 = vpop.permute.xlu0 %539 }
 0x133   : > { %v505_v30 = vpop.f32.mrf.mxu0 }
 0x134   : > { %v790_v31 = vmul.f32 -1.442695, %v505_v30 }
 0x135   : > { %v507_v32 = vpop.f32.mrf.mxu0 }
 0x136   : > { %915 = vpow2.f32 %v790_v31 }
 0x137   : > { %v509_v33 = vpop.f32.mrf.mxu0 }
 0x138   : > { %v791_v34 = vmul.f32 -1.442695, %v509_v33 }
 0x139   : > { %v511_v45 = vpop.f32.mrf.mxu0 }
 0x13a   : > { %917 = vpow2.f32 %v791_v34 }
 0x143   : > { %v916_v35 = vpop.eup %915 }
 0x144   : > { %v520_v36 = vadd.f32 1.0, %v916_v35 }
 0x146   : > { %919 = vrcp.f32 %v520_v36 }
 0x147   : > { %v918_v37 = vpop.eup %917 }
 0x148   : > { %v521_v38 = vadd.f32 1.0, %v918_v37 }
 0x14a   : > { %921 = vrcp.f32 %v521_v38 }
 0x153   : > { %v920_v39 = vpop.eup %919 }
 0x154   : > { %v526_v40 = vmul.f32 %v920_v39, %v505_v30 }
 0x156   : > { %v528_v43 = vmul.f32 %v526_v40, %v507_v32 }
 0x157   : > { %v922_v42 = vpop.eup %921 }
 0x158   : > { %v527_v44 = vmul.f32 %v922_v42, %v509_v33  ;;  %v542_v48 = vmul.f32 %v535_v41, %v528_v43 }
 0x15a   : > { %v529_v46 = vmul.f32 %v527_v44, %v511_v45 }
 0x15c   : > { %v543_v49 = vmul.f32 %v540_v47, %v529_v46 }
 0x15e   : > { %v546_v50 = vpack.c.bf16 %v543_v49, %v542_v48 }
 0x160   : > { %828 = vmatmul.mubr.bf16.vlgmr.msra.gmra.mxu1 %v546_v50 }
 0x220   : > { %v629_v52 = vpop.f32.mrf.mxu1 }
 0x221   : > { %v636_v53 = vadd.f32 %v629_v52, %v544_v51 }
 0x222   : > { %v829_v54 = vpop.f32.mrf.mxu1 }
 0x223   : > { %638 = vst.msk [vmem:[%s1131_s0] sm:$0xff] %vm467_vm1, %v636_v53 }
 0x224   : > { %v632_v56 = vpop.f32.mrf.mxu1 }
 0x225   : > { %v637_v57 = vadd.f32 %v632_v56, %v545_v55 }
 0x226   : > { %v830_v58 = vpop.f32.mrf.mxu1 }
 0x227   : > { %639 = vst.msk [vmem:[%s1131_s0 + $0x8] sm:$0xff] %vm467_vm1, %v637_v57 }
 0x228 PF: > { %s26_s11 = sadd.s32 1, %s1003_s11   ;;  %s1190_s1 = smov %s983_s30 }
 0x229   : > { %p23_p11 = scmp.ge.s32.totalorder %s26_s11, 26   ;;  %s1191_s30 = smov %s1103_s20 }
 0x22a   : > { %s1192_s7 = smov %s995_s9  ;;  %s1193_s8 = smov %s999_s10 }
 0x22b   : > { %s1194_s9 = smov %s1201_s12  ;;  %s1195_s10 = smov %s1199_s13 }
 0x22c   :  { %25 = sbr.rel (!%p23_p11) target bundleno = 30 (0x1e), region = 126 }

</bundles_post_ra>
